<compile_context>
chip_gen: v7x
topology: tpu7x:2x2x1
jax: 0.10.0
libtpu: 0.0.40
codegen_flags: <defaults>
</compile_context>

<pallas_src>
import math

import jax
import jax.numpy as jnp
from jax.experimental import pallas as pl
from jax.experimental.pallas import tpu as pltpu

_LANE = 128
_VMEM_BUDGET = 40 << 20   # target for resident weight + double-buffered tiles
_VMEM_LIMIT = 48 << 20    # scoped VMEM limit handed to Mosaic (fits v7x 64 MiB)


def _round_up(x, m):
    return (x + m - 1) // m * m


def _cdiv(a, b):
    return (a + b - 1) // b


def _sublane_align(dtype):
    # f32 -> 8, bf16 -> 16, int8/fp8 -> 32 (sub-32-bit dtypes pack sublanes).
    return max(8, 32 // jnp.dtype(dtype).itemsize)


def _pick_tile(dim, max_tile, align, min_blocks=1):
    """Tile size (multiple of `align`, <= max_tile) covering `dim` with minimal pad."""
    dim_a = _round_up(dim, align)
    max_tile = _round_up(max(min(max_tile, dim_a), align), align)
    n_blocks = max(_cdiv(dim_a, max_tile), min_blocks)
    tile = _round_up(_cdiv(dim_a, n_blocks), align)
    return tile, n_blocks * tile   # (tile, padded dim)


def _pad2d(a, rows, cols):
    r, c = a.shape
    if (r, c) == (rows, cols):
        return a
    return jnp.pad(a, ((0, rows - r), (0, cols - c)))


# ----------------------------- kernels ------------------------------------ #


def _linear_resident_kernel(x_ref, w_ref, b_ref, o_ref):
    """Weight + bias resident in VMEM; one MXU pass per M tile, bias fused."""
    o_ref[...] = (
        jnp.dot(x_ref[...], w_ref[...], preferred_element_type=jnp.float32)
        + b_ref[...].astype(jnp.float32)
    ).astype(o_ref.dtype)


def _linear_acc_kernel(x_ref, w_ref, b_ref, o_ref, acc_ref):
    """One (tm, tn) output tile; reduction over grid axis 2 (K)."""
    k = pl.program_id(2)

    @pl.when(k == 0)
    def _():
        acc_ref[...] = jnp.zeros_like(acc_ref)

    acc_ref[...] += jnp.dot(
        x_ref[...], w_ref[...], preferred_element_type=jnp.float32
    )

    @pl.when(k == pl.num_programs(2) - 1)
    def _():
        # Bias added exactly once, in the finalize step.
        o_ref[...] = (acc_ref[...] + b_ref[...].astype(jnp.float32)).astype(
            o_ref.dtype
        )


# ----------------------------- wrapper ------------------------------------ #


def dynamic_input_scaling(
    x, weight_t, bias, *, tm=1024, tn=512, tk=512, resident_weight_bytes=12 << 20
):
    """Apply Linear(input_dim -> out_dim) over the last dim of x.

    x:        [..., input_dim]
    weight_t: [input_dim, out_dim]   (transpose of torch's [out, in] weight)
    bias:     [out_dim]
    returns:  [..., out_dim]
    """
    in_dim, out_dim = weight_t.shape
    lead_shape = x.shape[:-1]
    m = int(math.prod(lead_shape)) if lead_shape else 1
    x2d = x.reshape(m, in_dim)

    # Tiny problems: per-grid-step (~0.35us) + launch overhead dwarfs a
    # sub-vreg matmul -> let XLA's fused dot handle it.
    if m * in_dim * out_dim < 8 * 128 * 128:
        out2d = x2d @ weight_t + bias
        return out2d.reshape(*lead_shape, out_dim)

    sub = _sublane_align(x.dtype)
    itemsize = jnp.dtype(x.dtype).itemsize
    w_item = jnp.dtype(weight_t.dtype).itemsize

    kp = _round_up(in_dim, _LANE)
    np_full = _round_up(out_dim, _LANE)
    w_bytes = kp * np_full * w_item

    mp_aligned = _round_up(m, sub)
    # Give both v7x TensorCores an M block when M is big enough (harmless on
    # 1-TC v5e/v6e: just one extra sequential grid step).
    min_m_blocks = 2 if mp_aligned >= 256 else 1

    if w_bytes <= resident_weight_bytes:
        # ---- Weight-resident fast path: 1-D grid over M only. ----
        per_row = 2 * (kp + np_full) * itemsize            # double-buffered x + out
        avail = max(_VMEM_BUDGET - 2 * (w_bytes + np_full * w_item), per_row * sub)
        tm_cap = max(sub, (avail // per_row) // sub * sub)
        tm_eff, mp = _pick_tile(m, min(tm, tm_cap), sub, min_blocks=min_m_blocks)

        x_p = _pad2d(x2d, mp, kp)
        w_p = _pad2d(weight_t, kp, np_full)
        b_p = _pad2d(bias.reshape(1, out_dim), 1, np_full)

        cost = pl.CostEstimate(
            flops=2 * mp * kp * np_full,
            transcendentals=0,
            bytes_accessed=(mp * kp + mp * np_full) * itemsize + w_bytes,
        )

        out2d = pl.pallas_call(
            _linear_resident_kernel,
            out_shape=jax.ShapeDtypeStruct((mp, np_full), x.dtype),
            grid_spec=pltpu.PrefetchScalarGridSpec(
                num_scalar_prefetch=0,
                grid=(mp // tm_eff,),
                in_specs=[
                    pl.BlockSpec((tm_eff, kp), lambda i: (i, 0)),
                    pl.BlockSpec((kp, np_full), lambda i: (0, 0)),  # resident W
                    pl.BlockSpec((1, np_full), lambda i: (0, 0)),   # resident bias
                ],
                out_specs=pl.BlockSpec((tm_eff, np_full), lambda i: (i, 0)),
            ),
            compiler_params=pltpu.CompilerParams(
                dimension_semantics=("parallel",),
                vmem_limit_bytes=_VMEM_LIMIT,
            ),
            cost_estimate=cost,
        )(x_p, w_p, b_p)
    else:
        # ---- Large weight: 3-D tiled GEMM with resident f32 accumulator. ----
        tm_eff, mp = _pick_tile(m, tm, sub, min_blocks=min_m_blocks)
        tn_eff, np_p = _pick_tile(out_dim, tn, _LANE)
        tk_eff, kp_p = _pick_tile(in_dim, tk, _LANE)

        x_p = _pad2d(x2d, mp, kp_p)
        w_p = _pad2d(weight_t, kp_p, np_p)
        b_p = _pad2d(bias.reshape(1, out_dim), 1, np_p)

        n_m, n_n, n_k = mp // tm_eff, np_p // tn_eff, kp_p // tk_eff
        cost = pl.CostEstimate(
            flops=2 * mp * kp_p * np_p,
            transcendentals=0,
            # x re-read per N block, W re-read per M block, out written once.
            bytes_accessed=(mp * kp_p * n_n + kp_p * np_p * n_m + mp * np_p)
            * itemsize,
        )

        out2d = pl.pallas_call(
            _linear_acc_kernel,
            out_shape=jax.ShapeDtypeStruct((mp, np_p), x.dtype),
            grid_spec=pltpu.PrefetchScalarGridSpec(
                num_scalar_prefetch=0,
                grid=(n_m, n_n, n_k),
                in_specs=[
                    pl.BlockSpec((tm_eff, tk_eff), lambda i, j, k: (i, k)),
                    pl.BlockSpec((tk_eff, tn_eff), lambda i, j, k: (k, j)),
                    pl.BlockSpec((1, tn_eff), lambda i, j, k: (0, j)),
                ],
                out_specs=pl.BlockSpec((tm_eff, tn_eff), lambda i, j, k: (i, j)),
                scratch_shapes=[pltpu.VMEM((tm_eff, tn_eff), jnp.float32)],
            ),
            compiler_params=pltpu.CompilerParams(
                dimension_semantics=("parallel", "parallel", "arbitrary"),
                vmem_limit_bytes=_VMEM_LIMIT,
            ),
            cost_estimate=cost,
        )(x_p, w_p, b_p)

    out2d = out2d[:m, :out_dim]
    return out2d.reshape(*lead_shape, out_dim)


def init_params(key, input_dim, scaling_factor=0.5, dtype=jnp.float32):
    """Deterministic init matching nn.Linear's default (uniform +/-1/sqrt(in))."""
    out_dim = int(input_dim * scaling_factor)
    k_w, k_b = jax.random.split(key)
    bound = 1.0 / math.sqrt(input_dim)
    # torch weight is [out, in]; we store its transpose [in, out] for the kernel.
    weight_t = jax.random.uniform(
        k_w, (input_dim, out_dim), dtype=dtype, minval=-bound, maxval=bound
    )
    bias = jax.random.uniform(
        k_b, (out_dim,), dtype=dtype, minval=-bound, maxval=bound
    )
    return weight_t, bias


if __name__ == "__main__":
    key = jax.random.PRNGKey(0)
    k_x, k_p = jax.random.split(key)

    # batch=2, seq=64, input_dim=256 -> out_dim = 128.
    batch, seq, input_dim = 2, 64, 256
    scaling_factor = 0.5
    out_dim = int(input_dim * scaling_factor)

    x = jax.random.normal(k_x, (batch, seq, input_dim), dtype=jnp.float32)
    weight_t, bias = init_params(k_p, input_dim, scaling_factor=scaling_factor)

    ref = (
        jnp.einsum(
            "bsi,io->bso", x, weight_t, precision=jax.lax.Precision.HIGHEST
        )
        + bias
    )

    # 1) Weight-resident fast path (default): 1-D grid over M, W DMA'd once.
    out_fast = jax.block_until_ready(dynamic_input_scaling(x, weight_t, bias))
    assert out_fast.shape == (batch, seq, out_dim)
    assert jnp.allclose(out_fast, ref, atol=2e-4, rtol=2e-4)

    # 2) Force the 3-D tiled-K fallback (acc scratch + pl.when init/finalize);
    #    small tiles give grid = (2, 1, 2).
    out_tiled = jax.block_until_ready(
        dynamic_input_scaling(
            x, weight_t, bias, tm=64, tn=128, tk=128, resident_weight_bytes=0
        )
    )
    assert out_tiled.shape == (batch, seq, out_dim)
    assert jnp.allclose(out_tiled, ref, atol=2e-4, rtol=2e-4)

    # 3) Tiny-shape path (original demo size) goes through the XLA bypass.
    x_small = jax.random.normal(k_x, (2, 8, 32), dtype=jnp.float32)
    w_s, b_s = init_params(k_p, 32, scaling_factor=scaling_factor)
    out_small = jax.block_until_ready(dynamic_input_scaling(x_small, w_s, b_s))
    ref_small = x_small @ w_s + b_s
    assert out_small.shape == (2, 8, 16)
    assert jnp.allclose(out_small, ref_small, atol=1e-5, rtol=1e-5)

    print("KERNEL_OK")
</pallas_src>

<mosaic_0001>
module attributes {stable_mosaic.version = 11 : i64} {
  func.func @_linear_resident_kernel(%arg0: i32, %arg1: memref<128x256xf32, #tpu.memory_space<vmem>>, %arg2: memref<256x128xf32, #tpu.memory_space<vmem>>, %arg3: memref<1x128xf32, #tpu.memory_space<vmem>>, %arg4: memref<128x128xf32, #tpu.memory_space<vmem>>) attributes {dimension_semantics = [#tpu.dimension_semantics<parallel>], iteration_bounds = array<i64: 1>, scalar_prefetch = 0 : i64, scratch_operands = 0 : i64, tpu.core_type = #tpu.core_type<tc>, window_params = [{transform_indices = @transform_0, window_bounds = array<i64: 128, 256>}, {pipeline_mode = #tpu.pipeline_mode<synchronous>, transform_indices = @transform_1, window_bounds = array<i64: 256, 128>}, {pipeline_mode = #tpu.pipeline_mode<synchronous>, transform_indices = @transform_2, window_bounds = array<i64: 1, 128>}, {transform_indices = @transform_3, window_bounds = array<i64: 128, 128>}]} {
    %c0 = arith.constant 0 : index
    %c0_0 = arith.constant 0 : index
    %0 = vector.load %arg1[%c0, %c0_0] : memref<128x256xf32, #tpu.memory_space<vmem>>, vector<128x256xf32>
    %c0_1 = arith.constant 0 : index
    %c0_2 = arith.constant 0 : index
    %1 = vector.load %arg2[%c0_1, %c0_2] : memref<256x128xf32, #tpu.memory_space<vmem>>, vector<256x128xf32>
    %cst = arith.constant dense<0.000000e+00> : vector<128x128xf32>
    %2 = tpu.matmul %0, %1, %cst {dimension_numbers = #tpu.dot_dimension_numbers<[1], [0], [0], [1], [0, 0, 1, 1], [], []>} : vector<128x256xf32>, vector<256x128xf32>, vector<128x128xf32> -> vector<128x128xf32>
    %c0_3 = arith.constant 0 : index
    %c0_4 = arith.constant 0 : index
    %3 = vector.load %arg3[%c0_3, %c0_4] : memref<1x128xf32, #tpu.memory_space<vmem>>, vector<1x128xf32>
    %4 = vector.broadcast %3 : vector<1x128xf32> to vector<128x128xf32>
    %5 = arith.addf %2, %4 : vector<128x128xf32>
    %c0_5 = arith.constant 0 : index
    %c0_6 = arith.constant 0 : index
    %6 = vector.load %arg4[%c0_5, %c0_6] : memref<128x128xf32, #tpu.memory_space<vmem>>, vector<128x128xf32>
    tpu.vector_store %arg4[%c0_5, %c0_6], %5 {strides = array<i32>} : memref<128x128xf32, #tpu.memory_space<vmem>>, vector<128x128xf32>,
    return
  }
  func.func @transform_0(%arg0: i32) -> (i32, i32) {
    %c0_i32 = arith.constant 0 : i32
    %c0_i32_0 = arith.constant 0 : i32
    return %arg0, %c0_i32 : i32, i32
  }
  func.func @transform_1(%arg0: i32) -> (i32, i32) {
    %c0_i32 = arith.constant 0 : i32
    %c0_i32_0 = arith.constant 0 : i32
    %c0_i32_1 = arith.constant 0 : i32
    return %c0_i32, %c0_i32_0 : i32, i32
  }
  func.func @transform_2(%arg0: i32) -> (i32, i32) {
    %c0_i32 = arith.constant 0 : i32
    %c0_i32_0 = arith.constant 0 : i32
    %c0_i32_1 = arith.constant 0 : i32
    return %c0_i32, %c0_i32_0 : i32, i32
  }
  func.func @transform_3(%arg0: i32) -> (i32, i32) {
    %c0_i32 = arith.constant 0 : i32
    %c0_i32_0 = arith.constant 0 : i32
    return %arg0, %c0_i32 : i32, i32
  }
}

</mosaic_0001>

<bundles_post_ra>
// kernel: tpu_custom_call.1
= control target key start
LH: loop header
LB: loop body
LE: loop exit
PB: predicated region body
PF: predicated region fallthrough
CT: control target
= control target key end

     0   :  { %8 = vsyncpa [#allocation3], 0  ;;  %s591_s0 = inlined_call_operand.hbm [shape: f32[128,256], index: 0, kind: input, shape index: {}]   ;;  %s592_s1 = inlined_call_operand.hbm [shape: f32[256,128], index: 1, kind: input, shape index: {}]   ;;  %s593_s2 = inlined_call_operand.vmem [shape: f32[1,128], index: 2, kind: input, shape index: {}]   ;;  %s594_s3 = inlined_call_operand.hbm [shape: f32[128,128], index: 3, kind: output, shape index: {}]  }
   0x1   :  { %9 = vsyncpa [#allocation6], 0 }
   0x2   :  { %10 = vsyncpa [#allocation4], 0  ;;  %s501_s12 = smov [#allocation2]   ;;  %s429_s16 = scalar_lea.hbm %s591_s0, 4096 }
   0x3   :  { %s16_s13 = sshll.u32 %s501_s12, 4  ;;  %p430_p0 = scmp.ne.s32.totalorder %s591_s0, %s429_s16  ;;  %s17_s13 = int_to_ptr.vmem [resolvable:$true] %s16_s13 }
   0x4   :  { %p433_p1 = scmp.lt.u32.totalorder %s429_s16, %s591_s0 }
   0x6   :  { %p435_p2 = pnand %p433_p1, %p430_p0 }
   0x8   :  { %438 = shalt.err (!%p435_p2)
}
   0x9   :  { %s439_s21 = scalar_lea.vmem %s17_s13, 4096  ;;  %p444_p4 = scmp.lt.s32.totalorder %s17_s13, %s17_s13 }
   0xa   :  { %p440_p3 = scmp.ne.s32.totalorder %s17_s13, %s439_s21  ;;  %p445_p5 = scmp.lt.s32.totalorder %s439_s21, %s439_s21 }
   0xc   :  { %p446_p6 = por %p445_p5, %p444_p4 }
   0xe   :  { %p447_p7 = pnand %p446_p6, %p440_p3 }
  0x10   :  { %450 = shalt.err (!%p447_p7)
}
  0x11   :  { %s502_s22 = smov 256   ;;  %s503_s23 = smov 16  }
  0x12   :  { %22 = dma.hbm_to_vmem [thread:$0]  %s591_s0, 4096, %s17_s13, [#allocation3], %s502_s22, %s502_s22, %s503_s23  }
  0x13   :  { %s504_s26 = smov [#allocation5]   ;;  %s451_s30 = scalar_lea.hbm %s592_s1, 4096 }
  0x14   :  { %s28_s27 = sshll.u32 %s504_s26, 4  ;;  %p452_p8 = scmp.ne.s32.totalorder %s592_s1, %s451_s30  ;;  %s29_s27 = int_to_ptr.vmem [resolvable:$true] %s28_s27 }
  0x15   :  { %p455_p9 = scmp.lt.u32.totalorder %s451_s30, %s592_s1 }
  0x17   :  { %p457_p10 = pnand %p455_p9, %p452_p8 }
  0x19   :  { %460 = shalt.err (!%p457_p10)
}
  0x1a   :  { %s461_s8 = scalar_lea.vmem %s29_s27, 4096  ;;  %p466_p12 = scmp.lt.s32.totalorder %s29_s27, %s29_s27 }
  0x1b   :  { %p462_p11 = scmp.ne.s32.totalorder %s29_s27, %s461_s8  ;;  %p467_p13 = scmp.lt.s32.totalorder %s461_s8, %s461_s8 }
  0x1d   :  { %p468_p0 = por %p467_p13, %p466_p12 }
  0x1f   :  { %p469_p1 = pnand %p468_p0, %p462_p11 }
  0x21   :  { %472 = shalt.err (!%p469_p1)
}
  0x22   :  { %s505_s0 = smov 128   ;;  %s506_s9 = smov 8  }
  0x23   :  { %34 = dma.hbm_to_vmem [thread:$0]  %s592_s1, 4096, %s29_s27, [#allocation6], %s505_s0, %s505_s0, %s506_s9  }
  0x24   :  { %495 = dma.done.wait [#allocation3], 4096  }
  0x25   :  { %496 = vsyncadd [#allocation3], 4294963200 }
  0x26   :  { %497 = dma.done.wait [#allocation6], 4096  }
  0x27   :  { %498 = vsyncadd [#allocation6], 4294963200  ;;  %v91_v0 = vld [vmem:[#allocation5 + $0x80] sm:$0xff]  ;;  %v92_v1 = vld [vmem:[#allocation5 + $0x88] sm:$0xff] }
  0x28   :  { %v75_v2 = vld [vmem:[#allocation5] sm:$0xff]  ;;  %v374_v3 = vpack.c.bf16 %v92_v1, %v91_v0  ;;  %v76_v4 = vld [vmem:[#allocation5 + $0x8] sm:$0xff]  ;;  %v93_v5 = vld [vmem:[#allocation5 + $0x90] sm:$0xff] }
  0x29   :  { %v94_v6 = vld [vmem:[#allocation5 + $0x98] sm:$0xff]  ;;  %v376_v7 = vpack.c.bf16 %v76_v4, %v75_v2  ;;  %v77_v9 = vld [vmem:[#allocation5 + $0x10] sm:$0xff]  ;;  %v95_v11 = vld [vmem:[#allocation5 + $0xa0] sm:$0xff] }
  0x2a   :  { %v378_v8 = vpack.c.bf16 %v94_v6, %v93_v5  ;;  %v78_v10 = vld [vmem:[#allocation5 + $0x18] sm:$0xff]  ;;  %375 = vmatprep.subr.bf16.mxu0 %v374_v3  ;;  %406 = vmatprep.subr.bf16.mxu1 %v374_v3  ;;  %v96_v12 = vld [vmem:[#allocation5 + $0xa8] sm:$0xff]  ;;  %v79_v15 = vld [vmem:[#allocation5 + $0x20] sm:$0xff] }
  0x2b   :  { %377 = vmatpush3.bf16.msra.mxu0 %v376_v7  ;;  %414 = vmatpush3.bf16.msra.mxu1 %v376_v7  ;;  %v380_v13 = vpack.c.bf16 %v78_v10, %v77_v9  ;;  %v382_v14 = vpack.c.bf16 %v96_v12, %v95_v11  ;;  %v80_v16 = vld [vmem:[#allocation5 + $0x28] sm:$0xff]  ;;  %v97_v17 = vld [vmem:[#allocation5 + $0xb0] sm:$0xff]  ;;  %v98_v18 = vld [vmem:[#allocation5 + $0xb8] sm:$0xff] }
  0x2c   :  { %379 = vmatprep.subr.bf16.mxu0 %v378_v8  ;;  %407 = vmatprep.subr.bf16.mxu1 %v378_v8  ;;  %v384_v19 = vpack.c.bf16 %v80_v16, %v79_v15  ;;  %v386_v20 = vpack.c.bf16 %v98_v18, %v97_v17  ;;  %v81_v21 = vld [vmem:[#allocation5 + $0x30] sm:$0xff]  ;;  %v82_v22 = vld [vmem:[#allocation5 + $0x38] sm:$0xff]  ;;  %v99_v23 = vld [vmem:[#allocation5 + $0xc0] sm:$0xff] }
  0x2d   :  { %v100_v24 = vld [vmem:[#allocation5 + $0xc8] sm:$0xff]  ;;  %v388_v27 = vpack.c.bf16 %v82_v22, %v81_v21  ;;  %v83_v29 = vld [vmem:[#allocation5 + $0x40] sm:$0xff]  ;;  %v101_v31 = vld [vmem:[#allocation5 + $0xd0] sm:$0xff] }
  0x2e   :  { %v44_v25 = vld [vmem:[#allocation2 + $0x8] sm:$0xff]  ;;  %v390_v28 = vpack.c.bf16 %v100_v24, %v99_v23  ;;  %v102_v32 = vld [vmem:[#allocation5 + $0xd8] sm:$0xff]  ;;  %v85_v35 = vld [vmem:[#allocation5 + $0x50] sm:$0xff] }
  0x2f   :  { %381 = vmatpush3.bf16.msra.mxu0 %v380_v13  ;;  %415 = vmatpush3.bf16.msra.mxu1 %v380_v13  ;;  %v60_v26 = vld [vmem:[#allocation2 + $0x88] sm:$0xff]  ;;  %v394_v34 = vpack.c.bf16 %v102_v32, %v101_v31  ;;  %v86_v36 = vld [vmem:[#allocation5 + $0x58] sm:$0xff]  ;;  %v103_v37 = vld [vmem:[#allocation5 + $0xe0] sm:$0xff] }
  0x30   :  { %383 = vmatprep.subr.bf16.mxu0 %v382_v14  ;;  %408 = vmatprep.subr.bf16.mxu1 %v382_v14  ;;  %v84_v30 = vld [vmem:[#allocation5 + $0x48] sm:$0xff]  ;;  %v396_v39 = vpack.c.bf16 %v86_v36, %v85_v35  ;;  %v87_v41 = vld [vmem:[#allocation5 + $0x60] sm:$0xff]  ;;  %v105_v43 = vld [vmem:[#allocation5 + $0xf0] sm:$0xff] }
  0x31   :  { %178 = vmatprep.mubr.f32.mxu0 %v44_v25  ;;  %218 = vmatprep.mubr.f32.mxu1 %v60_v26  ;;  %v392_v33 = vpack.c.bf16 %v84_v30, %v83_v29  ;;  %v104_v38 = vld [vmem:[#allocation5 + $0xe8] sm:$0xff]  ;;  %v106_v44 = vld [vmem:[#allocation5 + $0xf8] sm:$0xff]  ;;  %v89_v47 = vld [vmem:[#allocation5 + $0x70] sm:$0xff] }
  0x32   :  { %v398_v40 = vpack.c.bf16 %v104_v38, %v103_v37  ;;  %v88_v42 = vld [vmem:[#allocation5 + $0x68] sm:$0xff]  ;;  %v402_v46 = vpack.c.bf16 %v106_v44, %v105_v43  ;;  %v90_v48 = vld [vmem:[#allocation5 + $0x78] sm:$0xff]  ;;  %v43_v50 = vld [vmem:[#allocation2] sm:$0xff] }
  0x33   :  { %385 = vmatpush3.bf16.msra.mxu0 %v384_v19  ;;  %416 = vmatpush3.bf16.msra.mxu1 %v384_v19  ;;  %v400_v45 = vpack.c.bf16 %v88_v42, %v87_v41  ;;  %v404_v49 = vpack.c.bf16 %v90_v48, %v89_v47  ;;  %v59_v51 = vld [vmem:[#allocation2 + $0x80] sm:$0xff]  ;;  %v46_v52 = vld [vmem:[#allocation2 + $0x18] sm:$0xff]  ;;  %v45_v54 = vld [vmem:[#allocation2 + $0x10] sm:$0xff] }
  0x34   :  { %387 = vmatprep.subr.bf16.mxu0 %v386_v20  ;;  %409 = vmatprep.subr.bf16.mxu1 %v386_v20  ;;  %v62_v53 = vld [vmem:[#allocation2 + $0x98] sm:$0xff]  ;;  %v61_v55 = vld [vmem:[#allocation2 + $0x90] sm:$0xff]  ;;  %v48_v56 = vld [vmem:[#allocation2 + $0x28] sm:$0xff] }
  0x35   :  { %v64_v57 = vld [vmem:[#allocation2 + $0xa8] sm:$0xff]  ;;  %v47_v58 = vld [vmem:[#allocation2 + $0x20] sm:$0xff]  ;;  %v50_v60 = vld [vmem:[#allocation2 + $0x38] sm:$0xff] }
  0x36   :  { %v63_v59 = vld [vmem:[#allocation2 + $0xa0] sm:$0xff]  ;;  %v66_v61 = vld [vmem:[#allocation2 + $0xb8] sm:$0xff]  ;;  %v49_v62 = vld [vmem:[#allocation2 + $0x30] sm:$0xff] }
  0x37   :  { %389 = vmatpush3.bf16.msra.mxu0 %v388_v27  ;;  %417 = vmatpush3.bf16.msra.mxu1 %v388_v27  ;;  %v65_v63 = vld [vmem:[#allocation2 + $0xb0] sm:$0xff]  ;;  %v52_v0 = vld [vmem:[#allocation2 + $0x48] sm:$0xff]  ;;  %v51_v2 = vld [vmem:[#allocation2 + $0x40] sm:$0xff] }
  0x38   :  { %391 = vmatprep.subr.bf16.mxu0 %v390_v28  ;;  %410 = vmatprep.subr.bf16.mxu1 %v390_v28  ;;  %v68_v1 = vld [vmem:[#allocation2 + $0xc8] sm:$0xff]  ;;  %v67_v3 = vld [vmem:[#allocation2 + $0xc0] sm:$0xff]  ;;  %v54_v4 = vld [vmem:[#allocation2 + $0x58] sm:$0xff] }
  0x39   :  { %v70_v5 = vld [vmem:[#allocation2 + $0xd8] sm:$0xff]  ;;  %v53_v6 = vld [vmem:[#allocation2 + $0x50] sm:$0xff]  ;;  %v56_v8 = vld [vmem:[#allocation2 + $0x68] sm:$0xff] }
  0x3a   :  { %v69_v7 = vld [vmem:[#allocation2 + $0xd0] sm:$0xff]  ;;  %v72_v9 = vld [vmem:[#allocation2 + $0xe8] sm:$0xff]  ;;  %v55_v10 = vld [vmem:[#allocation2 + $0x60] sm:$0xff] }
  0x3b   :  { %393 = vmatpush3.bf16.msra.mxu0 %v392_v33  ;;  %418 = vmatpush3.bf16.msra.mxu1 %v392_v33  ;;  %v71_v11 = vld [vmem:[#allocation2 + $0xe0] sm:$0xff]  ;;  %v58_v12 = vld [vmem:[#allocation2 + $0x78] sm:$0xff]  ;;  %v57_v14 = vld [vmem:[#allocation2 + $0x70] sm:$0xff] }
  0x3c   :  { %395 = vmatprep.subr.bf16.mxu0 %v394_v34  ;;  %411 = vmatprep.subr.bf16.mxu1 %v394_v34  ;;  %v74_v13 = vld [vmem:[#allocation2 + $0xf8] sm:$0xff]  ;;  %v73_v15 = vld [vmem:[#allocation2 + $0xf0] sm:$0xff]  ;;  %v558_v18 = vld [vmem:[%s593_s2] ss:$0 sm:$0xff]  ;;  %s507_s2 = smov [#allocation7]  }
  0x3d   :  { %s280_s13 = sshll.u32 %s507_s2, 4  ;;  %s281_s13 = int_to_ptr.vmem [resolvable:$true] %s280_s13 }
  0x3e   :  { %s473_s14 = scalar_lea.vmem %s281_s13, 2048  ;;  %p478_p3 = scmp.lt.s32.totalorder %s281_s13, %s281_s13 }
  0x3f   :  { %397 = vmatpush3.bf16.msra.mxu0 %v396_v39  ;;  %419 = vmatpush3.bf16.msra.mxu1 %v396_v39  ;;  %p474_p2 = scmp.ne.s32.totalorder %s281_s13, %s473_s14  ;;  %p479_p4 = scmp.lt.s32.totalorder %s473_s14, %s473_s14 }
  0x40   :  { %399 = vmatprep.subr.bf16.mxu0 %v398_v40  ;;  %412 = vmatprep.subr.bf16.mxu1 %v398_v40 }
  0x41   :  { %p480_p5 = por %p479_p4, %p478_p3 }
  0x43   :  { %401 = vmatpush3.bf16.msra.mxu0 %v400_v45  ;;  %420 = vmatpush3.bf16.msra.mxu1 %v400_v45  ;;  %p481_p6 = pnand %p480_p5, %p474_p2 }
  0x44   :  { %403 = vmatprep.subr.bf16.mxu0 %v402_v46  ;;  %413 = vmatprep.subr.bf16.mxu1 %v402_v46 }
  0x47   :  { %405 = vmatpush3.bf16.msra.mxu0 %v404_v49  ;;  %421 = vmatpush3.bf16.msra.mxu1 %v404_v49 }
  0x4a   :  { %179 = vmatmul.mubr.f32.vlgmr.msra.gmra.mrb[0].mxu0 %v43_v50  ;;  %219 = vmatmul.mubr.f32.vlgmr.msra.gmra.mrb[0].mxu1 %v59_v51 }
  0x4b   :  { %183 = vmatprep.mubr.f32.mxu0 %v46_v52  ;;  %223 = vmatprep.mubr.f32.mxu1 %v62_v53 }
  0x4e   :  { %184 = vmatmul.mubr.f32.gmra.mrb[2].mxu0 %v45_v54  ;;  %224 = vmatmul.mubr.f32.gmra.mrb[2].mxu1 %v61_v55 }
  0x4f   :  { %188 = vmatprep.mubr.f32.mxu0 %v48_v56  ;;  %228 = vmatprep.mubr.f32.mxu1 %v64_v57 }
  0x52   :  { %189 = vmatmul.mubr.f32.gmra.mrb[4].mxu0 %v47_v58  ;;  %229 = vmatmul.mubr.f32.gmra.mrb[4].mxu1 %v63_v59 }
  0x53   :  { %193 = vmatprep.mubr.f32.mxu0 %v50_v60  ;;  %233 = vmatprep.mubr.f32.mxu1 %v66_v61 }
  0x56   :  { %194 = vmatmul.mubr.f32.gmra.mrb[6].mxu0 %v49_v62  ;;  %234 = vmatmul.mubr.f32.gmra.mrb[6].mxu1 %v65_v63 }
  0x57   :  { %198 = vmatprep.mubr.f32.mxu0 %v52_v0  ;;  %238 = vmatprep.mubr.f32.mxu1 %v68_v1 }
  0x5a   :  { %199 = vmatmul.mubr.f32.gmra.mrb[8].mxu0 %v51_v2  ;;  %239 = vmatmul.mubr.f32.gmra.mrb[8].mxu1 %v67_v3 }
  0x5b   :  { %203 = vmatprep.mubr.f32.mxu0 %v54_v4  ;;  %243 = vmatprep.mubr.f32.mxu1 %v70_v5 }
  0x5e   :  { %204 = vmatmul.mubr.f32.gmra.mrb[10].mxu0 %v53_v6  ;;  %244 = vmatmul.mubr.f32.gmra.mrb[10].mxu1 %v69_v7 }
  0x5f   :  { %208 = vmatprep.mubr.f32.mxu0 %v56_v8  ;;  %248 = vmatprep.mubr.f32.mxu1 %v72_v9 }
  0x62   :  { %209 = vmatmul.mubr.f32.gmra.mrb[12].mxu0 %v55_v10  ;;  %249 = vmatmul.mubr.f32.gmra.mrb[12].mxu1 %v71_v11 }
  0x63   :  { %213 = vmatprep.mubr.f32.mxu0 %v58_v12  ;;  %253 = vmatprep.mubr.f32.mxu1 %v74_v13 }
  0x66   :  { %214 = vmatmul.mubr.f32.gmra.mrb[14].mxu0 %v57_v14  ;;  %254 = vmatmul.mubr.f32.gmra.mrb[14].mxu1 %v73_v15 }
 0x11d   :  { %v326_v16 = vpop.f32.mrb[0].mxu0  ;;  %v350_v17 = vpop.f32.mrb[0].mxu1 }
 0x11e   :  { %v327_v19 = vpop.f32.mrb[1].mxu0  ;;  %v351_v20 = vpop.f32.mrb[1].mxu1 }
 0x11f   :  { %v328_v21 = vadd.f32 %v327_v19, %v326_v16  ;;  %v352_v22 = vadd.f32 %v351_v20, %v350_v17 }
 0x121   :  { %v181_v23 = vadd.f32 %v328_v21, %v558_v18  ;;  %v221_v24 = vadd.f32 %v352_v22, %v558_v18  ;;  %v329_v25 = vpop.f32.mrb[2].mxu0  ;;  %v353_v26 = vpop.f32.mrb[2].mxu1 }
 0x122   :  { %v330_v27 = vpop.f32.mrb[3].mxu0  ;;  %v354_v28 = vpop.f32.mrb[3].mxu1 }
 0x123   :  { %259 = vst [vmem:[#allocation7] sm:$0xff] %v181_v23  ;;  %267 = vst [vmem:[#allocation7 + $0x40] sm:$0xff] %v221_v24  ;;  %v331_v29 = vadd.f32 %v330_v27, %v329_v25  ;;  %v355_v30 = vadd.f32 %v354_v28, %v353_v26 }
 0x125   :  { %v186_v31 = vadd.f32 %v331_v29, %v558_v18  ;;  %v226_v32 = vadd.f32 %v355_v30, %v558_v18  ;;  %v332_v33 = vpop.f32.mrb[4].mxu0  ;;  %v356_v34 = vpop.f32.mrb[4].mxu1 }
 0x126   :  { %v333_v35 = vpop.f32.mrb[5].mxu0  ;;  %v357_v36 = vpop.f32.mrb[5].mxu1 }
 0x127   :  { %260 = vst [vmem:[#allocation7 + $0x8] sm:$0xff] %v186_v31  ;;  %268 = vst [vmem:[#allocation7 + $0x48] sm:$0xff] %v226_v32  ;;  %v334_v37 = vadd.f32 %v333_v35, %v332_v33  ;;  %v358_v38 = vadd.f32 %v357_v36, %v356_v34 }
 0x129   :  { %v191_v39 = vadd.f32 %v334_v37, %v558_v18  ;;  %v231_v40 = vadd.f32 %v358_v38, %v558_v18  ;;  %v335_v41 = vpop.f32.mrb[6].mxu0  ;;  %v359_v42 = vpop.f32.mrb[6].mxu1 }
 0x12a   :  { %v336_v43 = vpop.f32.mrb[7].mxu0  ;;  %v360_v44 = vpop.f32.mrb[7].mxu1 }
 0x12b   :  { %261 = vst [vmem:[#allocation7 + $0x10] sm:$0xff] %v191_v39  ;;  %269 = vst [vmem:[#allocation7 + $0x50] sm:$0xff] %v231_v40  ;;  %v337_v45 = vadd.f32 %v336_v43, %v335_v41  ;;  %v361_v46 = vadd.f32 %v360_v44, %v359_v42 }
 0x12d   :  { %v196_v47 = vadd.f32 %v337_v45, %v558_v18  ;;  %v236_v48 = vadd.f32 %v361_v46, %v558_v18  ;;  %v338_v49 = vpop.f32.mrb[8].mxu0  ;;  %v362_v50 = vpop.f32.mrb[8].mxu1 }
 0x12e   :  { %v339_v51 = vpop.f32.mrb[9].mxu0  ;;  %v363_v52 = vpop.f32.mrb[9].mxu1 }
 0x12f   :  { %262 = vst [vmem:[#allocation7 + $0x18] sm:$0xff] %v196_v47  ;;  %270 = vst [vmem:[#allocation7 + $0x58] sm:$0xff] %v236_v48  ;;  %v340_v53 = vadd.f32 %v339_v51, %v338_v49  ;;  %v364_v54 = vadd.f32 %v363_v52, %v362_v50 }
 0x131   :  { %v201_v55 = vadd.f32 %v340_v53, %v558_v18  ;;  %v241_v56 = vadd.f32 %v364_v54, %v558_v18  ;;  %v341_v57 = vpop.f32.mrb[10].mxu0  ;;  %v365_v58 = vpop.f32.mrb[10].mxu1 }
 0x132   :  { %v342_v59 = vpop.f32.mrb[11].mxu0  ;;  %v366_v60 = vpop.f32.mrb[11].mxu1 }
 0x133   :  { %263 = vst [vmem:[#allocation7 + $0x20] sm:$0xff] %v201_v55  ;;  %271 = vst [vmem:[#allocation7 + $0x60] sm:$0xff] %v241_v56  ;;  %v343_v61 = vadd.f32 %v342_v59, %v341_v57  ;;  %v367_v62 = vadd.f32 %v366_v60, %v365_v58 }
 0x135   :  { %v206_v63 = vadd.f32 %v343_v61, %v558_v18  ;;  %v246_v0 = vadd.f32 %v367_v62, %v558_v18  ;;  %v344_v1 = vpop.f32.mrb[12].mxu0  ;;  %v368_v2 = vpop.f32.mrb[12].mxu1 }
 0x136   :  { %v345_v3 = vpop.f32.mrb[13].mxu0  ;;  %v369_v4 = vpop.f32.mrb[13].mxu1 }
 0x137   :  { %264 = vst [vmem:[#allocation7 + $0x28] sm:$0xff] %v206_v63  ;;  %272 = vst [vmem:[#allocation7 + $0x68] sm:$0xff] %v246_v0  ;;  %v346_v5 = vadd.f32 %v345_v3, %v344_v1  ;;  %v370_v6 = vadd.f32 %v369_v4, %v368_v2 }
 0x139   :  { %v211_v7 = vadd.f32 %v346_v5, %v558_v18  ;;  %v251_v8 = vadd.f32 %v370_v6, %v558_v18  ;;  %v347_v9 = vpop.f32.mrb[14].mxu0  ;;  %v371_v10 = vpop.f32.mrb[14].mxu1 }
 0x13a   :  { %v348_v11 = vpop.f32.mrb[15].mxu0  ;;  %v372_v12 = vpop.f32.mrb[15].mxu1 }
 0x13b   :  { %265 = vst [vmem:[#allocation7 + $0x30] sm:$0xff] %v211_v7  ;;  %273 = vst [vmem:[#allocation7 + $0x70] sm:$0xff] %v251_v8  ;;  %v349_v13 = vadd.f32 %v348_v11, %v347_v9  ;;  %v373_v14 = vadd.f32 %v372_v12, %v371_v10 }
 0x13d   :  { %v216_v15 = vadd.f32 %v349_v13, %v558_v18  ;;  %v256_v16 = vadd.f32 %v373_v14, %v558_v18 }
 0x13f   :  { %266 = vst [vmem:[#allocation7 + $0x38] sm:$0xff] %v216_v15  ;;  %274 = vst [vmem:[#allocation7 + $0x78] sm:$0xff] %v256_v16 }
 0x140   :  { %484 = shalt.err (!%p481_p6)
}
 0x141   :  { %s485_s17 = scalar_lea.hbm %s594_s3, 2048 }
 0x142   :  { %p486_p7 = scmp.ne.s32.totalorder %s594_s3, %s485_s17  ;;  %p489_p8 = scmp.lt.u32.totalorder %s485_s17, %s594_s3 }
 0x144   :  { %p491_p9 = pnand %p489_p8, %p486_p7 }
 0x146   :  { %494 = shalt.err (!%p491_p9)
}
 0x147   :  { %286 = dma.vmem_to_hbm [thread:$0]  %s281_s13, 2048, %s594_s3, [#allocation4], %s505_s0, %s505_s0, %s506_s9  }
 0x148   :  { %499 = dma.done.wait [#allocation4], 2048  }
 0x149   :  { %500 = vsyncadd [#allocation4], 4294965248 }
 0x14a   :  { %290 = vsyncpa [#allocation3], 1 }
 0x14b   :  { %291 = vsyncpa [#allocation6], 1 }
 0x14c   :  { %292 = vsyncpa [#allocation4], 1 }

</bundles_post_ra>
